<compile_context>
chip_gen: v7x
topology: tpu7x:2x2x1
jax: 0.10.0
libtpu: 0.0.40
codegen_flags: <defaults>
</compile_context>

<pallas_src>
import jax
import jax.numpy as jnp
from jax.experimental import pallas as pl
from jax.experimental.pallas import tpu as pltpu


def _attention1d_kernel(x_ref, w_ref, m_ref, o_ref):
    # x_ref : (Nb, L, D)  block of Nb batch rows
    # w_ref : (1, D)      1x1-conv weight (shared across the grid)
    # m_ref : (Nb, L)     1.0 = keep, 0.0 = masked (-inf fill)
    # o_ref : (Nb, D)     aggregated output rows
    x = x_ref[...]
    w = w_ref[...]
    m = m_ref[...]
    nb, ell, d = x.shape

    # Logits s[b, l] = sum_d x[b, l, d] * w[d]   (MXU, lane-dense (Nb, L) result).
    # Conv bias is omitted on purpose: softmax is shift-invariant, so +b cancels.
    wb = jnp.broadcast_to(w.reshape(1, 1, d), (nb, 1, d)).astype(x.dtype)
    s = jnp.einsum("bod,bld->bol", wb, x,
                   preferred_element_type=jnp.float32)          # (Nb, 1, L)
    s = s.reshape(nb, ell)                                       # (Nb, L)

    # masked_fill_(~mask, -inf)
    s = jnp.where(m != 0.0, s, -jnp.inf)

    # Numerically-stable softmax along the sequence (lane) axis.
    # NOTE: a fully-masked row yields NaN, matching the PyTorch reference.
    s_max = jnp.max(s, axis=-1, keepdims=True)                   # (Nb, 1)
    e = jnp.exp(s - s_max)                                       # (Nb, L)
    p = e * pl.reciprocal(jnp.sum(e, axis=-1, keepdims=True), approx=False)

    # Weighted sum out[b, d] = sum_l p[b, l] * x[b, l, d]   (MXU, f32 accumulate).
    out = jnp.einsum("bql,bld->bqd",
                     p.reshape(nb, 1, ell).astype(x.dtype), x,
                     preferred_element_type=jnp.float32)          # (Nb, 1, D)
    o_ref[...] = out.reshape(nb, d).astype(o_ref.dtype)


def attention1d(x, weight, bias=None, input_mask=None, *, block_n=8):
    """Attention1d forward.

    x          : (N, L, D)  activations (f32 or bf16; dtype is preserved)
    weight     : (D,) or any shape with D elements (Conv1d(D, 1, 1) weight)
    bias       : scalar or None -- mathematically a no-op (softmax shift
                 invariance), accepted only for API parity and ignored.
    input_mask : (N, L) or (N, L, 1) or None; nonzero = keep.
    returns    : (N, D) in x.dtype
    """
    del bias  # exact no-op on the output; not worth a DMA stream.
    n, ell, d = x.shape
    w2d = jnp.asarray(weight).reshape(1, d).astype(x.dtype)

    if input_mask is None:
        mask = jnp.ones((n, ell), dtype=jnp.float32)
    else:
        mask = jnp.asarray(input_mask).reshape(n, ell).astype(jnp.float32)

    # Batch tile: multiple of 8 sublanes; pad N up so every block is full.
    nb = ((int(block_n) + 7) // 8) * 8
    n_pad = pl.cdiv(n, nb) * nb
    if n_pad != n:
        x = jnp.pad(x, ((0, n_pad - n), (0, 0), (0, 0)))
        # Ones-mask on padded rows avoids NaN softmax in the (discarded) padding.
        mask = jnp.pad(mask, ((0, n_pad - n), (0, 0)), constant_values=1.0)

    # Rough per-call VMEM need (double-buffered streams) -> raise the scoped
    # limit above the 16/32 MiB defaults when large blocks demand it, but stay
    # under v7x's 64 MiB physical VMEM.
    itemsize = x.dtype.itemsize
    vmem_needed = (2 * nb * ell * d * itemsize      # x (double-buffered)
                   + 2 * nb * ell * 4               # mask
                   + 2 * nb * d * itemsize          # out
                   + 2 * d * itemsize               # weight
                   + (4 << 20))                     # headroom / temporaries
    vmem_limit = int(min(max(vmem_needed, 32 << 20), 64 << 20))

    out = pl.pallas_call(
        _attention1d_kernel,
        out_shape=jax.ShapeDtypeStruct((n_pad, d), x.dtype),
        grid_spec=pltpu.PrefetchScalarGridSpec(
            num_scalar_prefetch=0,
            grid=(n_pad // nb,),
            in_specs=[
                pl.BlockSpec((nb, ell, d), lambda i: (i, 0, 0)),  # x rows
                pl.BlockSpec((1, d), lambda i: (0, 0)),           # weight (shared)
                pl.BlockSpec((nb, ell), lambda i: (i, 0)),        # mask rows
            ],
            out_specs=pl.BlockSpec((nb, d), lambda i: (i, 0)),    # dense (Nb, D)
        ),
        compiler_params=pltpu.CompilerParams(
            dimension_semantics=("parallel",),
            vmem_limit_bytes=vmem_limit,
        ),
    )(x, w2d, mask)
    return out[:n]


def attention1d_reference(x, weight, bias, input_mask=None):
    """Pure-JAX reference mirroring the PyTorch forward (bias included)."""
    n, ell, d = x.shape
    xf = x.astype(jnp.float32)
    attn = jnp.einsum("nld,d->nl", xf, jnp.asarray(weight).reshape(-1).astype(jnp.float32))
    if bias is not None:
        attn = attn + jnp.asarray(bias).astype(jnp.float32)
    if input_mask is not None:
        attn = jnp.where(jnp.asarray(input_mask).reshape(n, ell) != 0, attn, -jnp.inf)
    attn = jax.nn.softmax(attn, axis=-1)[..., None]               # (n, L, 1)
    return jnp.sum(attn * xf, axis=1)                             # (n, D)


if __name__ == "__main__":
    key = jax.random.PRNGKey(0)
    kx, kw, kb, km, kx2 = jax.random.split(key, 5)

    # Small shapes consistent with the module: n=2, seq_len=8, d_emb=32.
    n, ell, d = 2, 8, 32
    x = jax.random.normal(kx, (n, ell, d), dtype=jnp.float32)

    # Conv1d(in_dim, 1, kernel_size=1): weight (1, d, 1) -> (d,), bias (1,) -> scalar.
    weight = (jax.random.uniform(kw, (d,), dtype=jnp.float32) - 0.5) * 0.2
    bias = (jax.random.uniform(kb, (), dtype=jnp.float32) - 0.5) * 0.2

    # Binary mask with at least one valid position per row (avoids NaN rows).
    input_mask = (jax.random.uniform(km, (n, ell)) > 0.3).astype(jnp.float32)
    input_mask = input_mask.at[:, 0].set(1.0)

    out_nomask = jax.block_until_ready(attention1d(x, weight, bias, None))
    ref_nomask = attention1d_reference(x, weight, bias, None)
    assert out_nomask.shape == (n, d)
    assert jnp.allclose(out_nomask, ref_nomask, atol=1e-5, rtol=1e-5)

    out_mask = jax.block_until_ready(attention1d(x, weight, bias, input_mask))
    ref_mask = attention1d_reference(x, weight, bias, input_mask)
    assert jnp.allclose(out_mask, ref_mask, atol=1e-5, rtol=1e-5)

    # Larger batch exercising multiple grid steps (2 blocks of 8 rows).
    n2 = 16
    x2 = jax.random.normal(kx2, (n2, ell, d), dtype=jnp.float32)
    m2 = jnp.ones((n2, ell), dtype=jnp.float32)
    out2 = jax.block_until_ready(attention1d(x2, weight, bias, m2))
    ref2 = attention1d_reference(x2, weight, bias, m2)
    assert out2.shape == (n2, d)
    assert jnp.allclose(out2, ref2, atol=1e-5, rtol=1e-5)

    print("KERNEL_OK")
</pallas_src>

<mosaic_0001>
module attributes {stable_mosaic.version = 11 : i64} {
  func.func @_attention1d_kernel(%arg0: i32, %arg1: memref<8x8x32xf32, #tpu.memory_space<vmem>>, %arg2: memref<1x32xf32, #tpu.memory_space<vmem>>, %arg3: memref<8x8xf32, #tpu.memory_space<vmem>>, %arg4: memref<8x32xf32, #tpu.memory_space<vmem>>) attributes {dimension_semantics = [#tpu.dimension_semantics<parallel>], iteration_bounds = array<i64: 1>, scalar_prefetch = 0 : i64, scratch_operands = 0 : i64, tpu.core_type = #tpu.core_type<tc>, window_params = [{transform_indices = @transform_0, window_bounds = array<i64: 8, 8, 32>}, {pipeline_mode = #tpu.pipeline_mode<synchronous>, transform_indices = @transform_1, window_bounds = array<i64: 1, 32>}, {transform_indices = @transform_2, window_bounds = array<i64: 8, 8>}, {transform_indices = @transform_3, window_bounds = array<i64: 8, 32>}]} {
    %c0 = arith.constant 0 : index
    %c0_0 = arith.constant 0 : index
    %c0_1 = arith.constant 0 : index
    %0 = vector.load %arg1[%c0, %c0_0, %c0_1] : memref<8x8x32xf32, #tpu.memory_space<vmem>>, vector<8x8x32xf32>
    %c0_2 = arith.constant 0 : index
    %c0_3 = arith.constant 0 : index
    %1 = vector.load %arg2[%c0_2, %c0_3] : memref<1x32xf32, #tpu.memory_space<vmem>>, vector<1x32xf32>
    %c0_4 = arith.constant 0 : index
    %c0_5 = arith.constant 0 : index
    %2 = vector.load %arg3[%c0_4, %c0_5] : memref<8x8xf32, #tpu.memory_space<vmem>>, vector<8x8xf32>
    %3 = vector.shape_cast %1 : vector<1x32xf32> to vector<1x1x32xf32>
    %4 = vector.shape_cast %3 : vector<1x1x32xf32> to vector<1x1x32xf32>
    %5 = vector.broadcast %4 : vector<1x1x32xf32> to vector<8x1x32xf32>
    "tpu.trace_start"() <{level = 10 : i32, message = "bod,bld->bol"}> : () -> ()
    %cst = arith.constant dense<0.000000e+00> : vector<8x1x8xf32>
    %6 = tpu.matmul %5, %0, %cst {dimension_numbers = #tpu.dot_dimension_numbers<[2], [2], [1], [1], [0, 0, 0, 1, 1, 1], [0], [0]>} : vector<8x1x32xf32>, vector<8x8x32xf32>, vector<8x1x8xf32> -> vector<8x1x8xf32>
    "tpu.trace_stop"() : () -> ()
    %7 = vector.shape_cast %6 : vector<8x1x8xf32> to vector<8x8xf32>
    %cst_6 = arith.constant 0.000000e+00 : f32
    %8 = vector.broadcast %cst_6 : f32 to vector<8x8xf32>
    %9 = arith.cmpf one, %2, %8 : vector<8x8xf32>
    %cst_7 = arith.constant 0xFF800000 : f32
    %10 = vector.broadcast %cst_7 : f32 to vector<8x8xf32>
    %11 = arith.select %9, %7, %10 : vector<8x8xi1>, vector<8x8xf32>
    %cst_8 = arith.constant dense<0xFF800000> : vector<8xf32>
    %12 = vector.multi_reduction <maximumf>, %11, %cst_8 [1] : vector<8x8xf32> to vector<8xf32>
    %13 = vector.shape_cast %12 : vector<8xf32> to vector<8x1xf32>
    %14 = vector.broadcast %13 : vector<8x1xf32> to vector<8x8xf32>
    %15 = arith.subf %11, %14 : vector<8x8xf32>
    %16 = math.exp %15 : vector<8x8xf32>
    %cst_9 = arith.constant dense<0.000000e+00> : vector<8xf32>
    %17 = vector.multi_reduction <add>, %16, %cst_9 [1] : vector<8x8xf32> to vector<8xf32>
    %18 = vector.shape_cast %17 : vector<8xf32> to vector<8x1xf32>
    %19 = tpu.reciprocal %18 : vector<8x1xf32> -> vector<8x1xf32>
    %20 = vector.broadcast %19 : vector<8x1xf32> to vector<8x8xf32>
    %21 = arith.mulf %16, %20 : vector<8x8xf32>
    %22 = vector.shape_cast %21 : vector<8x8xf32> to vector<8x1x8xf32>
    "tpu.trace_start"() <{level = 10 : i32, message = "bql,bld->bqd"}> : () -> ()
    %cst_10 = arith.constant dense<0.000000e+00> : vector<8x1x32xf32>
    %23 = tpu.matmul %22, %0, %cst_10 {dimension_numbers = #tpu.dot_dimension_numbers<[2], [1], [1], [2], [0, 0, 0, 1, 1, 2], [0], [0]>} : vector<8x1x8xf32>, vector<8x8x32xf32>, vector<8x1x32xf32> -> vector<8x1x32xf32>
    "tpu.trace_stop"() : () -> ()
    %24 = vector.shape_cast %23 : vector<8x1x32xf32> to vector<8x32xf32>
    %c0_11 = arith.constant 0 : index
    %c0_12 = arith.constant 0 : index
    %25 = vector.load %arg4[%c0_11, %c0_12] : memref<8x32xf32, #tpu.memory_space<vmem>>, vector<8x32xf32>
    tpu.vector_store %arg4[%c0_11, %c0_12], %24 {strides = array<i32>} : memref<8x32xf32, #tpu.memory_space<vmem>>, vector<8x32xf32>,
    return
  }
  func.func @transform_0(%arg0: i32) -> (i32, i32, i32) {
    %c0_i32 = arith.constant 0 : i32
    %c0_i32_0 = arith.constant 0 : i32
    %c0_i32_1 = arith.constant 0 : i32
    return %arg0, %c0_i32, %c0_i32_0 : i32, i32, i32
  }
  func.func @transform_1(%arg0: i32) -> (i32, i32) {
    %c0_i32 = arith.constant 0 : i32
    %c0_i32_0 = arith.constant 0 : i32
    %c0_i32_1 = arith.constant 0 : i32
    return %c0_i32, %c0_i32_0 : i32, i32
  }
  func.func @transform_2(%arg0: i32) -> (i32, i32) {
    %c0_i32 = arith.constant 0 : i32
    %c0_i32_0 = arith.constant 0 : i32
    return %arg0, %c0_i32 : i32, i32
  }
  func.func @transform_3(%arg0: i32) -> (i32, i32) {
    %c0_i32 = arith.constant 0 : i32
    %c0_i32_0 = arith.constant 0 : i32
    return %arg0, %c0_i32 : i32, i32
  }
}

</mosaic_0001>

<bundles_post_ra>
// kernel: tpu_custom_call.1
= control target key start
LH: loop header
LB: loop body
LE: loop exit
PB: predicated region body
PF: predicated region fallthrough
CT: control target
= control target key end

     0   :  { %8 = vsyncpa [#allocation3], 0  ;;  %s1749_s0 = inlined_call_operand.hbm [shape: f32[8,8,32], index: 0, kind: input, shape index: {}]   ;;  %s1750_s1 = inlined_call_operand.vmem [shape: f32[1,32], index: 1, kind: input, shape index: {}]   ;;  %s1751_s2 = inlined_call_operand.hbm [shape: f32[8,8], index: 2, kind: input, shape index: {}]   ;;  %s1752_s3 = inlined_call_operand.hbm [shape: f32[8,32], index: 3, kind: output, shape index: {}]  }
   0x1   :  { %9 = vsyncpa [#allocation6], 0 }
   0x2   :  { %10 = vsyncpa [#allocation4], 0  ;;  %s1569_s12 = smov [#allocation2]   ;;  %s1497_s16 = scalar_lea.hbm %s1749_s0, 1024 }
   0x3   :  { %s16_s13 = sshll.u32 %s1569_s12, 4  ;;  %p1498_p0 = scmp.ne.s32.totalorder %s1749_s0, %s1497_s16  ;;  %s17_s13 = int_to_ptr.vmem [resolvable:$true] %s16_s13 }
   0x4   :  { %p1501_p1 = scmp.lt.u32.totalorder %s1497_s16, %s1749_s0 }
   0x6   :  { %p1503_p2 = pnand %p1501_p1, %p1498_p0 }
   0x8   :  { %1506 = shalt.err (!%p1503_p2)
}
   0x9   :  { %s1507_s21 = scalar_lea.vmem %s17_s13, 1024  ;;  %p1512_p4 = scmp.lt.s32.totalorder %s17_s13, %s17_s13 }
   0xa   :  { %p1508_p3 = scmp.ne.s32.totalorder %s17_s13, %s1507_s21  ;;  %p1513_p5 = scmp.lt.s32.totalorder %s1507_s21, %s1507_s21 }
   0xc   :  { %p1514_p6 = por %p1513_p5, %p1512_p4 }
   0xe   :  { %p1515_p7 = pnand %p1514_p6, %p1508_p3 }
  0x10   :  { %1518 = shalt.err (!%p1515_p7)
}
  0x11   :  { %s1570_s22 = smov 128   ;;  %s1571_s23 = smov 8  }
  0x12   :  { %22 = dma.hbm_to_vmem [thread:$0]  %s1749_s0, 1024, %s17_s13, [#allocation3], %s1570_s22, %s1570_s22, %s1571_s23  }
  0x13   :  { %s1572_s26 = smov [#allocation5]   ;;  %s1519_s30 = scalar_lea.hbm %s1751_s2, 128 }
  0x14   :  { %s31_s27 = sshll.u32 %s1572_s26, 4  ;;  %p1520_p8 = scmp.ne.s32.totalorder %s1751_s2, %s1519_s30  ;;  %s32_s27 = int_to_ptr.vmem [resolvable:$true] %s31_s27 }
  0x15   :  { %p1523_p9 = scmp.lt.u32.totalorder %s1519_s30, %s1751_s2 }
  0x17   :  { %p1525_p10 = pnand %p1523_p9, %p1520_p8 }
  0x19   :  { %1528 = shalt.err (!%p1525_p10)
}
  0x1a   :  { %s1529_s8 = scalar_lea.vmem %s32_s27, 128  ;;  %p1534_p12 = scmp.lt.s32.totalorder %s32_s27, %s32_s27 }
  0x1b   :  { %p1530_p11 = scmp.ne.s32.totalorder %s32_s27, %s1529_s8  ;;  %p1535_p13 = scmp.lt.s32.totalorder %s1529_s8, %s1529_s8 }
  0x1d   :  { %p1536_p0 = por %p1535_p13, %p1534_p12 }
  0x1f   :  { %p1537_p1 = pnand %p1536_p0, %p1530_p11 }
  0x21   :  { %1540 = shalt.err (!%p1537_p1)
}
  0x22   :  { %34 = dma.hbm_to_vmem [thread:$0]  %s1751_s2, 128, %s32_s27, [#allocation6]  }
  0x23   :  { %1563 = dma.done.wait [#allocation3], 1024  }
  0x24   :  { %1564 = vsyncadd [#allocation3], 4294966272 }
  0x25   :  { %1565 = dma.done.wait [#allocation6], 128  }
  0x26   :  { %1566 = vsyncadd [#allocation6], 4294967168  ;;  %v1573_v0 = vmov 0.0   ;;  %vm1574_vm0 = vmmov 0   ;;  %vm51_vm1 = vcmask 261120   ;;  %v41_v1 = vld [vmem:[#allocation2] sm:$0xff]  ;;  %v688_v51 = vlaneseq }
  0x27   :  { %1405 = vmatprep.subr.mxu0 %v1573_v0  ;;  %1410 = vmatprep.subr.mxu1 %v1573_v0  ;;  %v42_v2 = vld [vmem:[#allocation2 + $0x8] sm:$0xff]  ;;  %v49_v3 = vld [vmem:[%s1750_s1] sm:$0x1]  ;;  %v1633_v4 = vld [vmem:[#allocation2 + $0x10] sm:$0xff]  ;;  %vm649_vm2 = vcmask 1041409   ;;  %vm652_vm3 = vcmask 1042434  }
  0x28   :  { %1407 = vmatprep.mubr.msk.f32.mxu0 %vm1574_vm0, %v1573_v0  ;;  %1412 = vmatprep.mubr.msk.f32.mxu1 %vm1574_vm0, %v1573_v0  ;;  %v1636_v5 = vld [vmem:[#allocation2 + $0x18] sm:$0xff]  ;;  %v1648_v6 = vld [vmem:[#allocation2 + $0x20] sm:$0xff]  ;;  %v1650_v7 = vld [vmem:[#allocation2 + $0x28] sm:$0xff]  ;;  %vm655_vm4 = vcmask 1043459   ;;  %vm658_vm5 = vcmask 1044484   ;;  %vm661_vm6 = vcmask 1045509  }
  0x29   :  { %1406 = vmatpush3.xpose.msk.msra.mxu0 %vm51_vm1, %v41_v1  ;;  %1411 = vmatpush3.xpose.msk.msra.mxu1 %vm51_vm1, %v42_v2  ;;  %v1664_v8 = vld [vmem:[#allocation2 + $0x30] sm:$0xff]  ;;  %v1666_v9 = vld [vmem:[#allocation2 + $0x38] sm:$0xff]  ;;  %v50_v31 = vld [vmem:[#allocation5] sm:$0xff]  ;;  %vm664_vm7 = vcmask 1046534   ;;  %vm667_vm8 = vcmask 1047559   ;;  %vm671_vm10 = vcmask 64512  }
  0x2a   :  { %1415 = vmatprep.subr.mxu0 %v1573_v0  ;;  %1420 = vmatprep.subr.mxu1 %v1573_v0  ;;  %vm639_vm9 = vcmp.ne.f32.partialorder %v50_v31, 0.0  ;;  %v1575_v49 = vmov 1966171168   ;;  %v689_v53 = vshrl.u32 %v688_v51, 7  ;;  %s1576_s1 = smov [#allocation7]  }
  0x2b   :  { %v686_v50 = vunpack.c.l.s4 %v1575_v49  ;;  %s1339_s11 = sshll.u32 %s1576_s1, 4  ;;  %s1340_s11 = int_to_ptr.vmem [resolvable:$true] %s1339_s11 }
  0x2c   :  { %1408 = vmatmul.mubr.msk.f32.vlgmr.msra.gmra.mrb[0].mxu0 %vm51_vm1, %v49_v3  ;;  %1413 = vmatmul.mubr.msk.f32.vlgmr.msra.gmra.mrb[0].mxu1 %vm51_vm1, %v49_v3  ;;  %s1541_s12 = scalar_lea.vmem %s1340_s11, 128  ;;  %p1546_p3 = scmp.lt.s32.totalorder %s1340_s11, %s1340_s11 }
  0x2d   :  { %1416 = vmatpush3.xpose.msk.msra.mxu0 %vm51_vm1, %v1633_v4  ;;  %1421 = vmatpush3.xpose.msk.msra.mxu1 %vm51_vm1, %v1636_v5  ;;  %v687_v52 = vunpack.c.0.s8 %v686_v50  ;;  %p1542_p2 = scmp.ne.s32.totalorder %s1340_s11, %s1541_s12  ;;  %p1547_p4 = scmp.lt.s32.totalorder %s1541_s12, %s1541_s12 }
  0x2e   :  { %1417 = vmatprep.mubr.msk.f32.mxu0 %vm1574_vm0, %v1573_v0  ;;  %1422 = vmatprep.mubr.msk.f32.mxu1 %vm1574_vm0, %v1573_v0 }
  0x2f   :  { %1425 = vmatprep.subr.mxu0 %v1573_v0  ;;  %1430 = vmatprep.subr.mxu1 %v1573_v0  ;;  %v690_v54 = vsub.s32 %v687_v52, %v689_v53  ;;  %p1548_p5 = por %p1547_p4, %p1546_p3 }
  0x30   :  { %1418 = vmatmul.mubr.msk.f32.vlgmr.msra.gmra.mrb[2].mxu0 %vm51_vm1, %v49_v3  ;;  %1423 = vmatmul.mubr.msk.f32.vlgmr.msra.gmra.mrb[2].mxu1 %vm51_vm1, %v49_v3 }
  0x31   :  { %1426 = vmatpush3.xpose.msk.msra.mxu0 %vm51_vm1, %v1648_v6  ;;  %1431 = vmatpush3.xpose.msk.msra.mxu1 %vm51_vm1, %v1650_v7  ;;  %p1549_p6 = pnand %p1548_p5, %p1542_p2 }
  0x32   :  { %1427 = vmatprep.mubr.msk.f32.mxu0 %vm1574_vm0, %v1573_v0  ;;  %1432 = vmatprep.mubr.msk.f32.mxu1 %vm1574_vm0, %v1573_v0 }
  0x33   :  { %1435 = vmatprep.subr.mxu0 %v1573_v0  ;;  %1440 = vmatprep.subr.mxu1 %v1573_v0 }
  0x34   :  { %1428 = vmatmul.mubr.msk.f32.vlgmr.msra.gmra.mrb[4].mxu0 %vm51_vm1, %v49_v3  ;;  %1433 = vmatmul.mubr.msk.f32.vlgmr.msra.gmra.mrb[4].mxu1 %vm51_vm1, %v49_v3 }
  0x35   :  { %1436 = vmatpush3.xpose.msk.msra.mxu0 %vm51_vm1, %v1664_v8  ;;  %1441 = vmatpush3.xpose.msk.msra.mxu1 %vm51_vm1, %v1666_v9 }
  0x36   :  { %1437 = vmatprep.mubr.msk.f32.mxu0 %vm1574_vm0, %v1573_v0  ;;  %1442 = vmatprep.mubr.msk.f32.mxu1 %vm1574_vm0, %v1573_v0 }
  0x37   :  { %1445 = vmatprep.subr.mxu0 %v1573_v0  ;;  %1450 = vmatprep.subr.mxu1 %v1573_v0 }
  0x38   :  { %1438 = vmatmul.mubr.msk.f32.vlgmr.msra.gmra.mrb[6].mxu0 %vm51_vm1, %v49_v3  ;;  %1443 = vmatmul.mubr.msk.f32.vlgmr.msra.gmra.mrb[6].mxu1 %vm51_vm1, %v49_v3 }
  0x39   :  { %1446 = vmatpush3.msra.mxu0 %v41_v1  ;;  %1447 = vmatprep.mubr.msk.f32.mxu0 %vm1574_vm0, %v1573_v0 }
  0x3a   :  { %1451 = vmatpush3.msra.mxu1 %v42_v2  ;;  %1452 = vmatprep.mubr.msk.f32.mxu1 %vm1574_vm0, %v1573_v0 }
  0x3b   :  { %1455 = vmatprep.subr.mxu0 %v1573_v0  ;;  %1460 = vmatprep.subr.mxu1 %v1573_v0 }
  0xff   :  { %v124_v10 = vpop.f32.mrb[0].mxu0  ;;  %v197_v11 = vpop.f32.mrb[0].mxu1 }
 0x100   :  { %v648_v12 = vrot.slane %v197_v11, 7  ;;  %v1409_v13 = vpop.f32.mrb[1].mxu0  ;;  %v1414_v14 = vpop.f32.mrb[1].mxu1 }
 0x102   :  { %v650_v15 = vsel %vm649_vm2, %v648_v12, %v124_v10 }
 0x103   :  { %v270_v16 = vpop.f32.mrb[2].mxu0  ;;  %v343_v17 = vpop.f32.mrb[2].mxu1 }
 0x104   :  { %v651_v18 = vrot.slane %v270_v16, 6  ;;  %v1419_v19 = vpop.f32.mrb[3].mxu0  ;;  %v654_v20 = vrot.slane %v343_v17, 5  ;;  %v1424_v21 = vpop.f32.mrb[3].mxu1 }
 0x106   :  { %v653_v22 = vsel %vm652_vm3, %v651_v18, %v650_v15 }
 0x107   :  { %v656_v23 = vsel %vm655_vm4, %v654_v20, %v653_v22  ;;  %v416_v24 = vpop.f32.mrb[4].mxu0  ;;  %v489_v25 = vpop.f32.mrb[4].mxu1 }
 0x108   :  { %v657_v26 = vrot.slane %v416_v24, 4  ;;  %v1429_v27 = vpop.f32.mrb[5].mxu0  ;;  %v660_v28 = vrot.slane %v489_v25, 3  ;;  %v1434_v29 = vpop.f32.mrb[5].mxu1 }
 0x10a   :  { %v659_v30 = vsel %vm658_vm5, %v657_v26, %v656_v23 }
 0x10b   :  { %v662_v32 = vsel %vm661_vm6, %v660_v28, %v659_v30  ;;  %v562_v33 = vpop.f32.mrb[6].mxu0  ;;  %v635_v34 = vpop.f32.mrb[6].mxu1 }
 0x10c   :  { %v663_v35 = vrot.slane %v562_v33, 2  ;;  %v1439_v36 = vpop.f32.mrb[7].mxu0  ;;  %v666_v37 = vrot.slane %v635_v34, 1  ;;  %v1444_v38 = vpop.f32.mrb[7].mxu1 }
 0x10e   :  { %v665_v39 = vsel %vm664_vm7, %v663_v35, %v662_v32 }
 0x10f   :  { %v668_v40 = vsel %vm667_vm8, %v666_v37, %v665_v39 }
 0x110   :  { %v670_v41 = vsel %vm639_vm9, %v668_v40, -inf }
 0x111   :  { %v672_v42 = vsel %vm671_vm10, %v670_v41, -inf }
 0x112   :  { %673 = vmax.xlane.f32.xlu0 %v672_v42 }
 0x19f   :  { %v674_v43 = vpop.xlane.xlu0 %673 }
 0x1a0   :  { %v675_v44 = vsub.f32 %v670_v41, %v674_v43 }
 0x1a2   :  { %v676_v45 = vmul.f32 1.442695, %v675_v44 }
 0x1a4   :  { %1493 = vpow2.f32 %v676_v45 }
 0x1ae   :  { %v1494_v46 = vpop.eup %1493 }
 0x1af   :  { %v678_v47 = vsel %vm671_vm10, %v1494_v46, 0.0 }
 0x1b0   :  { %679 = vadd.xlane.f32.xlu0 %v678_v47 }
 0x23d   :  { %v680_v48 = vpop.xlane.xlu0 %679 }
 0x23e   :  { %1495 = vrcp.f32 %v680_v48 }
 0x248   :  { %v1496_v55 = vpop.eup %1495 }
 0x249   :  { %v682_v56 = vmul.f32 %v1496_v55, %v1494_v46 }
 0x24b   :  { %v684_v57 = vcombine.high %v682_v56, %v682_v56  ;;  %v691_v58 = vrot.slane %v682_v56, %v690_v54 }
 0x24d   :  { %v707_v59 = vrot.slane %v691_v58, %v690_v54  ;;  %v699_v60 = vcombine.high %v691_v58, %v691_v58  ;;  %v698_v62 = vrot.slane %v684_v57, %v690_v54 }
 0x24f   :  { %1448 = vmatmul.mubr.msk.f32.vlgmr.msra.gmra.mrb[8].mxu0 %vm671_vm10, %v707_v59  ;;  %v721_v61 = vrot.slane %v699_v60, %v690_v54  ;;  %v729_v63 = vcombine.high %v707_v59, %v707_v59  ;;  %v700_v2 = vcombine.high %v698_v62, %v698_v62  ;;  %v714_v3 = vrot.slane %v698_v62, %v690_v54 }
 0x250   :  { %1456 = vmatpush3.msra.mxu0 %v1633_v4  ;;  %1457 = vmatprep.mubr.msk.f32.mxu0 %vm1574_vm0, %v1573_v0 }
 0x251   :  { %1453 = vmatmul.mubr.msk.f32.vlgmr.msra.gmra.mrb[8].mxu1 %vm671_vm10, %v721_v61  ;;  %1465 = vmatprep.subr.mxu0 %v1573_v0  ;;  %v731_v1 = vcombine.high %v721_v61, %v721_v61  ;;  %v728_v4 = vrot.slane %v700_v2, %v690_v54 }
 0x252   :  { %1461 = vmatpush3.msra.mxu1 %v1636_v5  ;;  %1462 = vmatprep.mubr.msk.f32.mxu1 %vm1574_vm0, %v1573_v0  ;;  %v730_v5 = vcombine.high %v714_v3, %v714_v3 }
 0x253   :  { %1458 = vmatmul.mubr.msk.f32.vlgmr.msra.gmra.mrb[10].mxu0 %vm671_vm10, %v729_v63  ;;  %1470 = vmatprep.subr.mxu1 %v1573_v0 }
 0x254   :  { %1466 = vmatpush3.msra.mxu0 %v1648_v6  ;;  %1467 = vmatprep.mubr.msk.f32.mxu0 %vm1574_vm0, %v1573_v0  ;;  %v732_v6 = vcombine.high %v728_v4, %v728_v4 }
 0x255   :  { %1463 = vmatmul.mubr.msk.f32.vlgmr.msra.gmra.mrb[10].mxu1 %vm671_vm10, %v731_v1  ;;  %1475 = vmatprep.subr.mxu0 %v1573_v0 }
 0x256   :  { %1471 = vmatpush3.msra.mxu1 %v1650_v7  ;;  %1472 = vmatprep.mubr.msk.f32.mxu1 %vm1574_vm0, %v1573_v0 }
 0x257   :  { %1468 = vmatmul.mubr.msk.f32.vlgmr.msra.gmra.mrb[12].mxu0 %vm671_vm10, %v714_v3  ;;  %1480 = vmatprep.subr.mxu1 %v1573_v0 }
 0x258   :  { %1476 = vmatpush3.msra.mxu0 %v1664_v8  ;;  %1477 = vmatprep.mubr.msk.f32.mxu0 %vm1574_vm0, %v1573_v0 }
 0x259   :  { %1473 = vmatmul.mubr.msk.f32.vlgmr.msra.gmra.mrb[12].mxu1 %vm671_vm10, %v728_v4 }
 0x25a   :  { %1481 = vmatpush3.msra.mxu1 %v1666_v9  ;;  %1482 = vmatprep.mubr.msk.f32.mxu1 %vm1574_vm0, %v1573_v0 }
 0x25b   :  { %1478 = vmatmul.mubr.msk.f32.vlgmr.msra.gmra.mrb[14].mxu0 %vm671_vm10, %v730_v5 }
 0x25d   :  { %1483 = vmatmul.mubr.msk.f32.vlgmr.msra.gmra.mrb[14].mxu1 %vm671_vm10, %v732_v6 }
 0x322   :  { %v801_v7 = vpop.f32.mrb[8].mxu0 }
 0x323   :  { %v1449_v10 = vpop.f32.mrb[9].mxu0 }
 0x324   :  { %v873_v11 = vpop.f32.mrb[8].mxu1 }
 0x325   :  { %v1317_v8 = vrot.slane %v873_v11, 7  ;;  %v1454_v12 = vpop.f32.mrb[9].mxu1 }
 0x326   :  { %v945_v13 = vpop.f32.mrb[10].mxu0 }
 0x327   :  { %v1318_v14 = vsel %vm649_vm2, %v1317_v8, %v801_v7  ;;  %v1319_v15 = vrot.slane %v945_v13, 6  ;;  %v1459_v16 = vpop.f32.mrb[11].mxu0 }
 0x328   :  { %v1017_v17 = vpop.f32.mrb[10].mxu1 }
 0x329   :  { %v1320_v9 = vsel %vm652_vm3, %v1319_v15, %v1318_v14  ;;  %v1321_v18 = vrot.slane %v1017_v17, 5  ;;  %v1464_v0 = vpop.f32.mrb[11].mxu1 }
 0x32a   :  { %v1089_v19 = vpop.f32.mrb[12].mxu0 }
 0x32b   :  { %v1322_v20 = vsel %vm655_vm4, %v1321_v18, %v1320_v9  ;;  %v1323_v21 = vrot.slane %v1089_v19, 4  ;;  %v1469_v22 = vpop.f32.mrb[13].mxu0 }
 0x32c   :  { %v1161_v23 = vpop.f32.mrb[12].mxu1 }
 0x32d   :  { %v1324_v24 = vsel %vm658_vm5, %v1323_v21, %v1322_v20  ;;  %v1325_v25 = vrot.slane %v1161_v23, 3  ;;  %v1474_v26 = vpop.f32.mrb[13].mxu1 }
 0x32e   :  { %v1233_v27 = vpop.f32.mrb[14].mxu0 }
 0x32f   :  { %v1326_v28 = vsel %vm661_vm6, %v1325_v25, %v1324_v24  ;;  %v1327_v29 = vrot.slane %v1233_v27, 2  ;;  %v1479_v30 = vpop.f32.mrb[15].mxu0 }
 0x330   :  { %v1305_v31 = vpop.f32.mrb[14].mxu1 }
 0x331   :  { %v1328_v32 = vsel %vm664_vm7, %v1327_v29, %v1326_v28  ;;  %v1329_v33 = vrot.slane %v1305_v31, 1  ;;  %v1484_v34 = vpop.f32.mrb[15].mxu1 }
 0x333   :  { %v1330_v35 = vsel %vm667_vm8, %v1329_v33, %v1328_v32 }
 0x334   :  { %1332 = vst.msk [vmem:[#allocation7] sm:$0xff] %vm51_vm1, %v1330_v35 }
 0x335   :  { %1552 = shalt.err (!%p1549_p6)
}
 0x336   :  { %s1553_s15 = scalar_lea.hbm %s1752_s3, 128 }
 0x337   :  { %p1554_p7 = scmp.ne.s32.totalorder %s1752_s3, %s1553_s15  ;;  %p1557_p8 = scmp.lt.u32.totalorder %s1553_s15, %s1752_s3 }
 0x339   :  { %p1559_p9 = pnand %p1557_p8, %p1554_p7 }
 0x33b   :  { %1562 = shalt.err (!%p1559_p9)
}
 0x33c   :  { %1342 = dma.vmem_to_hbm [thread:$0]  %s1340_s11, 128, %s1752_s3, [#allocation4]  }
 0x33d   :  { %1567 = dma.done.wait [#allocation4], 128  }
 0x33e   :  { %1568 = vsyncadd [#allocation4], 4294967168 }
 0x33f   :  { %1346 = vsyncpa [#allocation3], 1 }
 0x340   :  { %1347 = vsyncpa [#allocation6], 1 }
 0x341   :  { %1348 = vsyncpa [#allocation4], 1 }

</bundles_post_ra>
